<compile_context>
chip_gen: v7x
topology: tpu7x:2x2x1
jax: 0.10.0
libtpu: 0.0.40
codegen_flags: <defaults>
</compile_context>

<pallas_src>
import jax
import jax.numpy as jnp
from jax.experimental import pallas as pl
from jax.experimental.pallas import tpu as pltpu


def _edge_transition_kernel(a_ref, b_ref, dis_ref, we_ref, o_ref):
    """One (batch, i-tile, j-tile) step: fused edge linear + node-term adds.

    a_ref:   (1, tile_j, H) f32   Hweight1(h[b, j]) + bh1 + be1   (j-indexed)
    b_ref:   (1, N, H)      f32   Hweight2(h[b, i]) + bh2         (full batch row)
    dis_ref: (1, tile_i, tile_j, H) native dtype                  (dis_mat tile)
    we_ref:  (H, H)         native dtype, Eweight1 transposed (in, out)
    o_ref:   (1, tile_i, tile_j, H) native dtype
    """
    _, ti, tj, hd = dis_ref.shape

    # --- edge term: the dominant MXU matmul, f32 accumulation ---------------
    # Flatten (ti, tj, H) -> (ti*tj, H): layout-free when tj % 8 == 0 (tile_j
    # is chosen as N or a multiple-of-8 divisor); otherwise Mosaic inserts a
    # relayout copy (correct, mildly slower for odd N).
    dis = dis_ref[0].reshape(ti * tj, hd)
    e = jnp.dot(dis, we_ref[...], preferred_element_type=jnp.float32)
    e = e.reshape(ti, tj, hd)

    # --- node terms (precomputed in the wrapper, already f32) ---------------
    a_j = a_ref[0]                                  # (tj, H), j-indexed term
    start = pl.program_id(1) * ti
    if ti % 8 == 0:
        start = pl.multiple_of(start, 8)
    b_i = b_ref[0, pl.ds(start, ti), :]             # (ti, H), i-indexed term

    out = e + a_j[None, :, :] + b_i[:, None, :]
    o_ref[...] = out[None].astype(o_ref.dtype)


def _largest_divisor_leq(n: int, cap: int) -> int:
    cap = max(1, min(int(cap), n))
    best = 1
    for d in range(1, cap + 1):
        if n % d == 0:
            best = d
    return best


def _largest_mult8_divisor_leq(n: int, cap: int):
    cap = max(1, min(int(cap), n))
    best = None
    for d in range(8, cap + 1, 8):
        if n % d == 0:
            best = d
    return best


def _vmem_budget():
    """(vmem_limit_bytes, target_block_bytes) for the current TPU generation."""
    try:
        cap = int(pltpu.get_tpu_info().vmem_capacity_bytes)
    except Exception:
        cap = None
    if cap is not None and cap >= 128 * 1024 * 1024:        # v5e / v6e (128 MiB)
        return 100 * 1024 * 1024, 8 * 1024 * 1024
    return 48 * 1024 * 1024, 4 * 1024 * 1024                # v7x (64 MiB/TC) / unknown


def edge_transition(h, dis_mat, w_e1, b_e1, w_h1, b_h1, w_h2, b_h2,
                    *, interpret=False):
    """Forward pass of EdgeTransition.

    h:       (B, N, H)
    dis_mat: (B, N, N, H)
    w_*:     (H, H) nn.Linear weights (out, in);  b_*: (H,) biases
    returns  (B, N, N, H) in dis_mat's dtype
    """
    B, N, H = h.shape
    assert dis_mat.shape == (B, N, N, H), "dis_mat must be (B, N, N, H)"

    vmem_limit, target = _vmem_budget()
    itemsize = dis_mat.dtype.itemsize
    row_bytes = N * H * itemsize                     # one full i-row (all j)

    if row_bytes <= target:
        tile_j = N
        tile_i = _largest_divisor_leq(N, max(1, target // row_bytes))
    else:
        # A single i-row already exceeds the block budget: tile the j axis too
        # (tile_j must be a multiple of 8 or N for the (8,128) block rule).
        tile_i = 1
        tj = _largest_mult8_divisor_leq(N, max(8, target // (H * itemsize)))
        tile_j = tj if tj is not None else N

    grid = (B, N // tile_i, N // tile_j)

    # Precompute the tiny node terms once per batch (f32), folding Eweight1's
    # bias into the j-term so the kernel does only two full-size adds.
    f32 = jnp.float32
    h32 = h.astype(f32)
    a_term = h32 @ w_h1.T.astype(f32) + b_h1.astype(f32) + b_e1.astype(f32)  # Hweight1(h[b, j])
    b_term = h32 @ w_h2.T.astype(f32) + b_h2.astype(f32)                     # Hweight2(h[b, i])

    # Edge weight pre-transposed and kept in the input dtype (bf16 stays bf16
    # -> native MXU rate; accumulation is f32 inside the kernel).
    we_t = w_e1.T.astype(dis_mat.dtype)

    # TODO(synk): for H < 128 the trailing block dim under-fills the 128 lanes
    # (masked vld/vst).  Folding j into the lane dim (view as (B, N, N*H)) and
    # reshaping to (., H) only around the MXU dot is the remaining lever, but
    # needs an in-kernel minor-dim relayout; left out pending benchmarking.
    out = pl.pallas_call(
        _edge_transition_kernel,
        out_shape=jax.ShapeDtypeStruct((B, N, N, H), dis_mat.dtype),
        grid_spec=pltpu.PrefetchScalarGridSpec(
            num_scalar_prefetch=0,
            grid=grid,
            in_specs=[
                pl.BlockSpec((1, tile_j, H), lambda b, i, j: (b, j, 0)),     # node j-term
                pl.BlockSpec((1, N, H), lambda b, i, j: (b, 0, 0)),          # node i-term (full)
                pl.BlockSpec((1, tile_i, tile_j, H),
                             lambda b, i, j: (b, i, j, 0)),                  # dis_mat tile
                pl.BlockSpec((H, H), lambda b, i, j: (0, 0)),                # Eweight1^T
            ],
            out_specs=pl.BlockSpec((1, tile_i, tile_j, H),
                                   lambda b, i, j: (b, i, j, 0)),
        ),
        compiler_params=pltpu.CompilerParams(
            dimension_semantics=("parallel", "parallel", "parallel"),
            vmem_limit_bytes=vmem_limit,
        ),
        interpret=interpret,
    )(a_term, b_term, dis_mat, we_t)

    return out


def edge_transition_reference(h, dis_mat, w_e1, b_e1, w_h1, b_h1, w_h2, b_h2):
    """Pure-JAX reference matching the PyTorch EdgeTransition.forward."""
    hf = h.astype(jnp.float32)
    df = dis_mat.astype(jnp.float32)
    dis_emb = df @ w_e1.T.astype(jnp.float32) + b_e1.astype(jnp.float32)
    h1 = hf @ w_h1.T.astype(jnp.float32) + b_h1.astype(jnp.float32)   # Hweight1(h[b, j])
    h2 = hf @ w_h2.T.astype(jnp.float32) + b_h2.astype(jnp.float32)   # Hweight2(h[b, i])
    out = h1[:, None, :, :] + h2[:, :, None, :] + dis_emb
    return out.astype(dis_mat.dtype)


if __name__ == "__main__":
    key = jax.random.PRNGKey(0)
    ks = jax.random.split(key, 8)

    batch, num_nodes, hidden_dim = 2, 8, 32
    h = jax.random.normal(ks[0], (batch, num_nodes, hidden_dim), dtype=jnp.float32)
    dis_mat = jax.random.normal(
        ks[1], (batch, num_nodes, num_nodes, hidden_dim), dtype=jnp.float32)

    bound = 1.0 / (hidden_dim ** 0.5)   # PyTorch nn.Linear default init range
    w_e1 = jax.random.uniform(ks[2], (hidden_dim, hidden_dim), jnp.float32, -bound, bound)
    b_e1 = jax.random.uniform(ks[3], (hidden_dim,), jnp.float32, -bound, bound)
    w_h1 = jax.random.uniform(ks[4], (hidden_dim, hidden_dim), jnp.float32, -bound, bound)
    b_h1 = jax.random.uniform(ks[5], (hidden_dim,), jnp.float32, -bound, bound)
    w_h2 = jax.random.uniform(ks[6], (hidden_dim, hidden_dim), jnp.float32, -bound, bound)
    b_h2 = jax.random.uniform(ks[7], (hidden_dim,), jnp.float32, -bound, bound)

    y = edge_transition(h, dis_mat, w_e1, b_e1, w_h1, b_h1, w_h2, b_h2)
    y = jax.block_until_ready(y)

    y_ref = edge_transition_reference(h, dis_mat, w_e1, b_e1, w_h1, b_h1, w_h2, b_h2)
    assert y.shape == (batch, num_nodes, num_nodes, hidden_dim)
    assert jnp.allclose(y, y_ref, atol=1e-4, rtol=1e-4), "mismatch vs reference"

    print("KERNEL_OK")
</pallas_src>

<mosaic_0001>
module attributes {stable_mosaic.version = 11 : i64} {
  func.func @_edge_transition_kernel(%arg0: i32, %arg1: i32, %arg2: i32, %arg3: memref<1x8x32xf32, #tpu.memory_space<vmem>>, %arg4: memref<1x8x32xf32, #tpu.memory_space<vmem>>, %arg5: memref<1x8x8x32xf32, #tpu.memory_space<vmem>>, %arg6: memref<32x32xf32, #tpu.memory_space<vmem>>, %arg7: memref<1x8x8x32xf32, #tpu.memory_space<vmem>>) attributes {dimension_semantics = [#tpu.dimension_semantics<parallel>, #tpu.dimension_semantics<parallel>, #tpu.dimension_semantics<parallel>], iteration_bounds = array<i64: 2, 1, 1>, scalar_prefetch = 0 : i64, scratch_operands = 0 : i64, tpu.core_type = #tpu.core_type<tc>, window_params = [{transform_indices = @transform_0, window_bounds = array<i64: 1, 8, 32>}, {transform_indices = @transform_1, window_bounds = array<i64: 1, 8, 32>}, {transform_indices = @transform_2, window_bounds = array<i64: 1, 8, 8, 32>}, {pipeline_mode = #tpu.pipeline_mode<synchronous>, transform_indices = @transform_3, window_bounds = array<i64: 32, 32>}, {transform_indices = @transform_4, window_bounds = array<i64: 1, 8, 8, 32>}]} {
    %c0 = arith.constant 0 : index
    %c0_0 = arith.constant 0 : index
    %c0_1 = arith.constant 0 : index
    %c0_2 = arith.constant 0 : index
    %0 = vector.load %arg5[%c0, %c0_0, %c0_1, %c0_2] : memref<1x8x8x32xf32, #tpu.memory_space<vmem>>, vector<1x8x8x32xf32>
    %1 = vector.shape_cast %0 : vector<1x8x8x32xf32> to vector<8x8x32xf32>
    %2 = vector.shape_cast %1 : vector<8x8x32xf32> to vector<64x32xf32>
    %c0_3 = arith.constant 0 : index
    %c0_4 = arith.constant 0 : index
    %3 = vector.load %arg6[%c0_3, %c0_4] : memref<32x32xf32, #tpu.memory_space<vmem>>, vector<32x32xf32>
    %cst = arith.constant dense<0.000000e+00> : vector<64x32xf32>
    %4 = tpu.matmul %2, %3, %cst {dimension_numbers = #tpu.dot_dimension_numbers<[1], [0], [0], [1], [0, 0, 1, 1], [], []>} : vector<64x32xf32>, vector<32x32xf32>, vector<64x32xf32> -> vector<64x32xf32>
    %5 = vector.shape_cast %4 : vector<64x32xf32> to vector<8x8x32xf32>
    %c0_5 = arith.constant 0 : index
    %c0_6 = arith.constant 0 : index
    %c0_7 = arith.constant 0 : index
    %6 = vector.load %arg3[%c0_5, %c0_6, %c0_7] : memref<1x8x32xf32, #tpu.memory_space<vmem>>, vector<1x8x32xf32>
    %7 = vector.shape_cast %6 : vector<1x8x32xf32> to vector<8x32xf32>
    %c8_i32 = arith.constant 8 : i32
    %8 = arith.muli %arg1, %c8_i32 : i32
    %9 = tpu.assume_multiple %8, 8 : i32
    %c0_8 = arith.constant 0 : index
    %10 = arith.index_cast %9 : i32 to index
    %c0_9 = arith.constant 0 : index
    %11 = vector.load %arg4[%c0_8, %10, %c0_9] : memref<1x8x32xf32, #tpu.memory_space<vmem>>, vector<1x8x32xf32>
    %12 = vector.shape_cast %11 : vector<1x8x32xf32> to vector<8x32xf32>
    %13 = vector.shape_cast %7 : vector<8x32xf32> to vector<1x8x32xf32>
    %14 = vector.broadcast %13 : vector<1x8x32xf32> to vector<8x8x32xf32>
    %15 = arith.addf %5, %14 : vector<8x8x32xf32>
    %16 = vector.shape_cast %12 : vector<8x32xf32> to vector<8x1x32xf32>
    %17 = vector.broadcast %16 : vector<8x1x32xf32> to vector<8x8x32xf32>
    %18 = arith.addf %15, %17 : vector<8x8x32xf32>
    %19 = vector.shape_cast %18 : vector<8x8x32xf32> to vector<1x8x8x32xf32>
    %c0_10 = arith.constant 0 : index
    %c0_11 = arith.constant 0 : index
    %c0_12 = arith.constant 0 : index
    %c0_13 = arith.constant 0 : index
    %20 = vector.load %arg7[%c0_10, %c0_11, %c0_12, %c0_13] : memref<1x8x8x32xf32, #tpu.memory_space<vmem>>, vector<1x8x8x32xf32>
    tpu.vector_store %arg7[%c0_10, %c0_11, %c0_12, %c0_13], %19 {strides = array<i32>} : memref<1x8x8x32xf32, #tpu.memory_space<vmem>>, vector<1x8x8x32xf32>,
    return
  }
  func.func @transform_0(%arg0: i32, %arg1: i32, %arg2: i32) -> (i32, i32, i32) {
    %c0_i32 = arith.constant 0 : i32
    %c0_i32_0 = arith.constant 0 : i32
    return %arg0, %arg2, %c0_i32 : i32, i32, i32
  }
  func.func @transform_1(%arg0: i32, %arg1: i32, %arg2: i32) -> (i32, i32, i32) {
    %c0_i32 = arith.constant 0 : i32
    %c0_i32_0 = arith.constant 0 : i32
    %c0_i32_1 = arith.constant 0 : i32
    return %arg0, %c0_i32, %c0_i32_0 : i32, i32, i32
  }
  func.func @transform_2(%arg0: i32, %arg1: i32, %arg2: i32) -> (i32, i32, i32, i32) {
    %c0_i32 = arith.constant 0 : i32
    %c0_i32_0 = arith.constant 0 : i32
    return %arg0, %arg1, %arg2, %c0_i32 : i32, i32, i32, i32
  }
  func.func @transform_3(%arg0: i32, %arg1: i32, %arg2: i32) -> (i32, i32) {
    %c0_i32 = arith.constant 0 : i32
    %c0_i32_0 = arith.constant 0 : i32
    %c0_i32_1 = arith.constant 0 : i32
    return %c0_i32, %c0_i32_0 : i32, i32
  }
  func.func @transform_4(%arg0: i32, %arg1: i32, %arg2: i32) -> (i32, i32, i32, i32) {
    %c0_i32 = arith.constant 0 : i32
    %c0_i32_0 = arith.constant 0 : i32
    return %arg0, %arg1, %arg2, %c0_i32 : i32, i32, i32, i32
  }
}

</mosaic_0001>

<bundles_post_ra>
// kernel: tpu_custom_call.1
= control target key start
LH: loop header
LB: loop body
LE: loop exit
PB: predicated region body
PF: predicated region fallthrough
CT: control target
= control target key end

     0   :  { %s1518_s0 = inlined_call_operand.hbm [shape: f32[2,8,32], index: 0, kind: input, shape index: {}]   ;;  %s1519_s1 = inlined_call_operand.hbm [shape: f32[2,8,32], index: 1, kind: input, shape index: {}]   ;;  %s1520_s2 = inlined_call_operand.hbm [shape: f32[2,8,8,32], index: 2, kind: input, shape index: {}]   ;;  %s1521_s3 = inlined_call_operand.hbm [shape: f32[32,32], index: 3, kind: input, shape index: {}]   ;;  %s1522_s4 = inlined_call_operand.hbm [shape: f32[2,8,8,32], index: 4, kind: output, shape index: {}]  }
   0x1   :  { %1538 = sst [smem:[#allocation21_spill]] %s1519_s1 }
   0x2   :  { %9 = vsyncpa [#allocation3], 0 }
   0x3   :  { %11 = vsyncpa [#allocation3 + $0x1], 0 }
   0x4   :  { %12 = vsyncpa [#allocation6], 0 }
   0x5   :  { %14 = vsyncpa [#allocation6 + $0x1], 0 }
   0x6   :  { %15 = vsyncpa [#allocation9], 0 }
   0x7   :  { %16 = vsyncpa [#allocation4], 0 }
   0x8   :  { %18 = vsyncpa [#allocation4 + $0x1], 0  ;;  %s1172_s15 = smov 0   ;;  %s1174_s16 = smov 0  }
   0x9   :  { %s1176_s17 = smov 0   ;;  %s1178_s18 = smov 0  }
   0xa   :  { %s1180_s19 = smov 0   ;;  %s1182_s20 = smov 0  }
   0xb LB: > { %1539 = sst [smem:[#allocation15_spill]] %s1115_s15  ;;  %s43_s21 = sadd.s32 1, %s1131_s19  ;;  %s1135_s20 = sphi %s1182_s20, %s24_s20   ;;  %s1131_s19 = sphi %s1180_s19, %s1573_s19   ;;  %s1127_s18 = sphi %s1178_s18, %s1572_s18   ;;  %s1123_s17 = sphi %s1176_s17, %s1568_s17   ;;  %s1119_s16 = sphi %s1174_s16, %s1571_s16   ;;  %s1115_s15 = sphi %s1172_s15, %s1570_s15  }
   0xc   : > { %1540 = sst [smem:[#allocation16_spill]] %s1123_s17  ;;  %s52_s22 = sadd.s32 1, %s1123_s17 }
   0xd   : > { %1541 = sst [smem:[#allocation17_spill]] %s1135_s20  ;;  %p45_p0 = scmp.ge.s32.totalorder %s43_s21, 2 }
   0xe   : > { %p1523_p1 = scmp.ne.s32.totalorder %s1123_s17, %s1119_s16  ;;  %p60_p2 = scmp.eq.s32.totalorder %s1135_s20, 0 }
   0xf   : > { %s1575_s21 = smov (%p45_p0, %s43_s21), 0  ;;  %p870_p5 = scmp.lt.s32.totalorder %s1135_s20, 2 }
  0x10   : > { %1542 = sst [smem:[#allocation18_spill]] %s1575_s21  ;;  %p61_p4 = por %p60_p2, %p1523_p1 }
  0x11   : > { %s47_s23 = ssub.s32 %s1131_s19, %s1575_s21  ;;  %s1217_s24 = sand.u32 1, %s1123_s17  }
  0x12   : > { %p50_p6 = scmp.eq.s32.totalorder %s47_s23, 0  ;;  %s767_s25 = sshll.u32 %s1217_s24, 3 }
  0x13   : > { %s768_s26 = sshll.u32 %s1131_s19, 7  ;;  %p1221_p7 = pnand %p870_p5, %p61_p4 }
  0x14   : > { %s1226_s28 = scalar_select %p50_p6, %s1123_s17, %s52_s22  }
  0x15   : > { %s1543_s27 = scalar_select %p1221_p7, 1, 0 }
  0x16   : > { %1544 = sst [smem:[#allocation19_spill]] %s1226_s28  ;;  %s228_s29 = sand.u32 1, %s1135_s20  }
  0x17   : > { %s1545_s1 = sld [smem:[#allocation21_spill]]  ;;  %s232_s7 = scalar_lea.vmem [#allocation5], %s767_s25 }
  0x18   : > { %s239_s8 = sshll.u32 %s232_s7, 4  ;;  %s771_s9 = sshll.u32 %s1217_s24, 6  ;;  %s1238_s8 = int_to_ptr.vmem [resolvable:$true] %s239_s8 }
  0x19   : > { %s1241_s10 = scalar_lea.sflag [#allocation6], %s228_s29  ;;  %p1247_p9 = pneg %p1221_p7 }
  0x1b   : > { %s1546_s12 = scalar_select %p1247_p9, 1, 0 }
  0x1d   : > { %s1234_s6 = scalar_lea.hbm %s1545_s1, %s768_s26  ;;  %s932_s22 = scalar_lea.hbm %s1545_s1, 256 }
  0x1e   : > { %s927_s11 = scalar_lea.hbm %s1234_s6, 128  ;;  %p933_p12 = scmp.lt.u32.totalorder %s1234_s6, %s1545_s1 }
  0x1f   : > { %p928_p8 = scmp.ne.s32.totalorder %s1234_s6, %s927_s11  ;;  %p934_p13 = scmp.lt.u32.totalorder %s932_s22, %s927_s11 }
  0x20   : > { %p936_p2 = scmp.lt.u32.totalorder %s927_s11, %s1234_s6 }
  0x21   : > { %p930_p10 = pnand %p1247_p9, %p928_p8  ;;  %p935_p0 = por %p934_p13, %p933_p12 }
  0x23   : > { %p931_p11 = pneg %p930_p10  ;;  %p937_p4 = por %p936_p2, %p935_p0 }
  0x25   : > { %p938_p5 = pnand %p937_p4, %p931_p11 }
  0x27   : > { %941 = shalt.err (!%p938_p5)
}
  0x28   : > { %s942_s29 = scalar_lea.vmem %s1238_s8, 128  ;;  %s1137_s5 = smov [#allocation5]  }
  0x29   : > { %p943_p6 = scmp.ne.s32.totalorder %s1238_s8, %s942_s29  ;;  %s947_s7 = sshll.u32 %s1137_s5, 4  ;;  %s948_s7 = int_to_ptr.vmem [resolvable:$false] %s947_s7 }
  0x2a   : > { %s949_s13 = scalar_lea.vmem %s948_s7, 256  ;;  %p950_p3 = scmp.lt.s32.totalorder %s1238_s8, %s948_s7 }
  0x2b   : > { %p945_p8 = pnand %p943_p6, %p1247_p9  ;;  %p951_p1 = scmp.lt.s32.totalorder %s949_s13, %s942_s29 }
  0x2d   : > { %p946_p10 = pneg %p945_p8  ;;  %p952_p12 = por %p951_p1, %p950_p3 }
  0x2f   : > { %p953_p13 = pnand %p952_p12, %p946_p10 }
  0x31   : > { %956 = shalt.err (!%p953_p13)
}
  0x32   : > { %861 = dma.hbm_to_vmem [thread:$0]  (!%p1221_p7), %s1234_s6, 128, %s1238_s8, %s1241_s10  }
  0x33   : > { %s250_s11 = scalar_lea.vmem [#allocation7], %s771_s9  ;;  %s1276_s22 = sadd.s32 4294967295, %s1135_s20  }
  0x34   : > { %s260_s14 = sshll.u32 %s250_s11, 4  ;;  %s763_s23 = sadd.s32 4294967294, %s1135_s20   ;;  %s1273_s14 = int_to_ptr.vmem [resolvable:$true] %s260_s14 }
  0x35   : > { %p65_p1 = scmp.ne.s32.totalorder %s1119_s16, %s1115_s15  ;;  %p1530_p3 = scmp.eq.s32.totalorder %s1276_s22, 0 }
  0x36   : > { %p170_p11 = scmp.eq.s32.totalorder %s1276_s22, 1  ;;  %p176_p0 = scmp.eq.s32.totalorder %s763_s23, 1 }
  0x37   : > { %p764_p2 = scmp.ge.s32.totalorder %s1135_s20, 1  ;;  %p1286_p4 = por %p1530_p3, %p65_p1 }
  0x38   : > { %p1548_p5 = scmp.ne.s32.totalorder %s1123_s17, %s1119_s16  ;;  %p1297_p8 = por %p176_p0, %p65_p1 }
  0x39   : > { %s1547_s6 = scalar_select %p1286_p4, 1, 0 }
  0x3a   : > { %p1293_p6 = por %p170_p11, %p1548_p5  ;;  %p183_p10 = scmp.lt.s32.totalorder %s1135_s20, 3 }
  0x3b   : > { %s1550_s9 = scalar_select %p1297_p8, 1, 0 }
  0x3c   : > { %s1549_s8 = scalar_select %p1293_p6, 1, 0 }
  0x3d   : > { %1551 = sst [smem:[#allocation20_spill]] %s1550_s9  ;;  %p1302_p12 = pnand %p764_p2, %p183_p10 }
  0x3e   : > { %s1138_s29 = smov [#allocation8]   ;;  %s1321_s23 = scalar_lea.hbm %s1518_s0, %s768_s26 }
  0x3f   : > { %s1552_s30 = scalar_select %p1302_p12, 1, 0 }
  0x40   : > { %s195_s5 = sshll.u32 %s1138_s29, 4  ;;  %p851_p13 = pneg %p1302_p12  ;;  %s1306_s5 = int_to_ptr.vmem [resolvable:$true] %s195_s5 }
  0x41   : > { %s213_s1 = scalar_lea.vmem [#allocation2], %s767_s25  ;;  %s957_s20 = scalar_lea.hbm %s1521_s3, 512 }
  0x42   : > { %p1312_p11 = pnand %p851_p13, %p1530_p3  ;;  %s221_s21 = sshll.u32 %s213_s1, 4  ;;  %s1326_s21 = int_to_ptr.vmem [resolvable:$true] %s221_s21 }
  0x43   : > { %p958_p1 = scmp.ne.s32.totalorder %s1521_s3, %s957_s20  ;;  %p964_p10 = scmp.lt.u32.totalorder %s957_s20, %s1521_s3 }
  0x44   : > { %p959_p0 = pneg %p1312_p11 }
  0x46   : > { %p960_p2 = pnand %p959_p0, %p958_p1 }
  0x48   : > { %p961_p5 = pneg %p960_p2 }
  0x4a   : > { %p966_p13 = pnand %p964_p10, %p961_p5 }
  0x4c   : > { %969 = shalt.err (!%p966_p13)
}
  0x4d   : > { %s970_s1 = scalar_lea.vmem %s1306_s5, 512  ;;  %p978_p4 = scmp.lt.s32.totalorder %s1306_s5, %s1306_s5 }
  0x4e   : > { %p971_p3 = scmp.ne.s32.totalorder %s1306_s5, %s970_s1  ;;  %p979_p12 = scmp.lt.s32.totalorder %s970_s1, %s970_s1 }
  0x50   : > { %p973_p8 = pnand %p971_p3, %p959_p0  ;;  %p980_p7 = por %p979_p12, %p978_p4 }
  0x52   : > { %p974_p6 = pneg %p973_p8 }
  0x54   : > { %p981_p9 = pnand %p980_p7, %p974_p6 }
  0x56   : > { %984 = shalt.err (!%p981_p9)
}
  0x57   : > { %s1139_s15 = smov 128   ;;  %s1140_s17 = smov 8  }
  0x58   : > { %854 = dma.hbm_to_vmem [thread:$0]  (!%p1312_p11), %s1521_s3, 512, %s1306_s5, [#allocation9], %s1139_s15, %s1139_s15, %s1140_s17  }
  0x59   : > { %s210_s28 = scalar_lea.sflag [#allocation3], %s1217_s24  ;;  %s985_s9 = scalar_lea.hbm %s1321_s23, 128 }
  0x5a   : > { %p986_p7 = scmp.ne.s32.totalorder %s1321_s23, %s985_s9  ;;  %p1554_p9 = scmp.ne.s32.totalorder %s1546_s12, 0 }
  0x5b   : > { %s990_s13 = scalar_lea.hbm %s1518_s0, 256  ;;  %p991_p6 = scmp.lt.u32.totalorder %s1321_s23, %s1518_s0 }
  0x5c   : > { %p988_p3 = pnand %p986_p7, %p1554_p9  ;;  %p992_p8 = scmp.lt.u32.totalorder %s990_s13, %s985_s9 }
  0x5d   : > { %p994_p1 = scmp.lt.u32.totalorder %s985_s9, %s1321_s23 }
  0x5e   : > { %p989_p4 = pneg %p988_p3  ;;  %p993_p12 = por %p992_p8, %p991_p6 }
  0x60   : > { %p995_p0 = por %p994_p1, %p993_p12 }
  0x62   : > { %p996_p2 = pnand %p995_p0, %p989_p4 }
  0x64   : > { %999 = shalt.err (!%p996_p2)
}
  0x65   : > { %s1000_s24 = scalar_lea.vmem %s1326_s21, 128  ;;  %s1141_s5 = smov [#allocation2]  }
  0x66   : > { %p1001_p11 = scmp.ne.s32.totalorder %s1326_s21, %s1000_s24  ;;  %s1005_s7 = sshll.u32 %s1141_s5, 4  ;;  %s1006_s7 = int_to_ptr.vmem [resolvable:$false] %s1005_s7 }
  0x67   : > { %s1007_s29 = scalar_lea.vmem %s1006_s7, 256  ;;  %p1008_p13 = scmp.lt.s32.totalorder %s1326_s21, %s1006_s7 }
  0x68   : > { %p1003_p5 = pnand %p1001_p11, %p1554_p9  ;;  %p1009_p7 = scmp.lt.s32.totalorder %s1007_s29, %s1000_s24 }
  0x6a   : > { %p1004_p10 = pneg %p1003_p5  ;;  %p1010_p3 = por %p1009_p7, %p1008_p13 }
  0x6c   : > { %p1011_p6 = pnand %p1010_p3, %p1004_p10 }
  0x6e   : > { %1014 = shalt.err (!%p1011_p6)
}
  0x6f   : > { %p1555_p4 = scmp.ne.s32.totalorder %s1543_s27, 0  ;;  %s1556_s20 = sshll.u32 %s1131_s19, 10 }
  0x70   : > { %s1379_s11 = scalar_lea.hbm %s1520_s2, %s1556_s20  ;;  %s1020_s24 = scalar_lea.hbm %s1520_s2, 2048 }
  0x71   : > { %858 = dma.hbm_to_vmem [thread:$0]  (!%p1555_p4), %s1321_s23, 128, %s1326_s21, %s210_s28  }
  0x72   : > { %s1015_s26 = scalar_lea.hbm %s1379_s11, 1024  ;;  %p1021_p0 = scmp.lt.u32.totalorder %s1379_s11, %s1520_s2 }
  0x73   : > { %p1016_p8 = scmp.ne.s32.totalorder %s1379_s11, %s1015_s26  ;;  %p1022_p2 = scmp.lt.u32.totalorder %s1020_s24, %s1015_s26 }
  0x74   : > { %p1024_p5 = scmp.lt.u32.totalorder %s1015_s26, %s1379_s11 }
  0x75   : > { %p1018_p12 = pnand %p1016_p8, %p1554_p9  ;;  %p1023_p11 = por %p1022_p2, %p1021_p0 }
  0x77   : > { %p1019_p1 = pneg %p1018_p12  ;;  %p1025_p10 = por %p1024_p5, %p1023_p11 }
  0x79   : > { %p1026_p13 = pnand %p1025_p10, %p1019_p1 }
  0x7b   : > { %1029 = shalt.err (!%p1026_p13)
}
  0x7c   : > { %s1030_s28 = scalar_lea.vmem %s1273_s14, 1024  ;;  %s1142_s5 = smov [#allocation7]  }
  0x7d   : > { %p1031_p7 = scmp.ne.s32.totalorder %s1273_s14, %s1030_s28  ;;  %s1035_s7 = sshll.u32 %s1142_s5, 4  ;;  %s1036_s7 = int_to_ptr.vmem [resolvable:$false] %s1035_s7 }
  0x7e   : > { %s1037_s29 = scalar_lea.vmem %s1036_s7, 2048  ;;  %p1038_p8 = scmp.lt.s32.totalorder %s1273_s14, %s1036_s7 }
  0x7f   : > { %p1033_p3 = pnand %p1031_p7, %p1554_p9  ;;  %p1039_p12 = scmp.lt.s32.totalorder %s1037_s29, %s1030_s28 }
  0x81   : > { %p1034_p6 = pneg %p1033_p3  ;;  %p1040_p0 = por %p1039_p12, %p1038_p8 }
  0x83   : > { %p1041_p2 = pnand %p1040_p0, %p1034_p6 }
  0x85   : > { %1044 = shalt.err (!%p1041_p2)
}
  0x86   : > { %864 = dma.hbm_to_vmem [thread:$0]  (!%p1555_p4), %s1379_s11, 1024, %s1273_s14, %s1241_s10, %s1139_s15, %s1139_s15, %s1140_s17  }
  0x87   : > { %p1557_p9 = scmp.ne.s32.totalorder %s1552_s30, 0 }
  0x88   : > { %s1409_s12 = sand.u32 (!%p1557_p9), 1, %s1119_s16   ;;  %p1558_p1 = scmp.ne.s32.totalorder (!%p1557_p9), %s1547_s6, 0 }
  0x89   : > { %272 = sbr.rel (%p1557_p9) target bundleno = 399 (0x18f), region = 36  ;;  %s775_s20 = sshll.u32 (!%p1557_p9), %s1409_s12, 3 }
  0x8a   : > { %s275_s25 = scalar_lea.sflag (!%p1557_p9), [#allocation3], %s1409_s12  ;;  %s1413_s9 = scalar_lea.vmem (!%p1557_p9), [#allocation2], %s775_s20 }
  0x90   : > { %1098 = dma.done.wait (%p1558_p1), %s275_s25, 128  }
  0x91   : > { %1100 = vsyncadd (%p1558_p1), %s275_s25, 4294967168  ;;  %s283_s27 = sand.u32 1, %s1276_s22   ;;  %s1420_s14 = scalar_lea.vmem [#allocation5], %s775_s20 }
  0x92   : > { %s284_s10 = scalar_lea.sflag [#allocation6], %s283_s27 }
  0x93   : > { %1102 = dma.done.wait (%p1558_p1), %s284_s10, 1152  }
  0x94   : > { %1104 = vsyncadd (%p1558_p1), %s284_s10, 4294966144  ;;  %s777_s30 = sshll.u32 %s1409_s12, 6  ;;  %p1559_p4 = scmp.eq.s32.totalorder %s1276_s22, 0 }
  0x95   : > { %s1429_s15 = scalar_lea.vmem [#allocation7], %s777_s30 }
  0x96   : > { %1106 = dma.done.wait (%p1559_p4), [#allocation9], 512   ;;  %p1560_p11 = pmov %p1559_p4 }
  0x97   : > { %vm349_vm0 = vcmask 261120   ;;  %v345_v0 = vld [vmem:[#allocation8] sm:$0xff]  ;;  %v346_v1 = vld [vmem:[#allocation8 + $0x8] sm:$0xff]  ;;  %v347_v2 = vld [vmem:[#allocation8 + $0x10] sm:$0xff]  ;;  %v1143_v14 = vmov 1966171168   ;;  %v496_v16 = vlaneseq }
  0x98   : > { %1108 = vsyncadd (%p1560_p11), [#allocation9], 4294966784  ;;  %v827_v3 = vpack.c.bf16 %v346_v1, %v345_v0  ;;  %v348_v4 = vld [vmem:[#allocation8 + $0x18] sm:$0xff]  ;;  %v337_v5 = vld [vmem:[%s1429_s15] sm:$0xff]  ;;  %v494_v15 = vunpack.c.l.s4 %v1143_v14  ;;  %s794_s22 = sshll.u32 %s1127_s18, 10  ;;  %s334_s6 = scalar_lea.vmem [#allocation10], %s777_s30 }
  0x99   : > { %v341_v6 = vld [vmem:[%s1429_s15 + $0x20] sm:$0xff]  ;;  %v831_v7 = vpack.c.bf16 %v348_v4, %v347_v2  ;;  %815 = vmatprep.mubr.msk.f32.mxu0 %vm349_vm0, %v337_v5  ;;  %v338_v8 = vld [vmem:[%s1429_s15 + $0x8] sm:$0xff]  ;;  %v339_v10 = vld [vmem:[%s1429_s15 + $0x10] sm:$0xff]  ;;  %v497_v18 = vshrl.u32 %v496_v16, 7  ;;  %s614_s17 = sshll.u32 %s334_s6, 4  ;;  %s1463_s26 = scalar_lea.hbm %s1522_s4, %s794_s22  ;;  %s1465_s17 = int_to_ptr.vmem [resolvable:$true] %s614_s17 }
  0x9a   : > { %821 = vmatprep.mubr.msk.f32.mxu1 %vm349_vm0, %v341_v6  ;;  %828 = vmatprep.subr.bf16.mxu0 %v827_v3  ;;  %v342_v9 = vld [vmem:[%s1429_s15 + $0x28] sm:$0xff]  ;;  %v343_v11 = vld [vmem:[%s1429_s15 + $0x30] sm:$0xff]  ;;  %v340_v12 = vld [vmem:[%s1429_s15 + $0x18] sm:$0xff]  ;;  %v495_v17 = vunpack.c.0.s8 %v494_v15  ;;  %s598_s13 = scalar_lea.sflag [#allocation4], %s1409_s12  ;;  %s1045_s1 = scalar_lea.vmem %s1465_s17, 1024 }
  0x9b   : > { %835 = vmatprep.subr.bf16.mxu1 %v827_v3  ;;  %830 = vmatpush3.bf16.msra.mxu0 %v827_v3  ;;  %v344_v13 = vld [vmem:[%s1429_s15 + $0x38] sm:$0xff]  ;;  %v543_v27 = vsub.s32 0, %v497_v18  ;;  %v479_v31 = vld [vmem:[%s1413_s9] sm:$0xff]  ;;  %p1046_p5 = scmp.ne.s32.totalorder %s1465_s17, %s1045_s1  ;;  %p1561_p10 = scmp.ne.s32.totalorder %s1549_s8, 0 }
  0x9c   : > { %837 = vmatpush3.bf16.msra.mxu1 %v827_v3  ;;  %832 = vmatprep.subr.bf16.mxu0 %v831_v7  ;;  %v482_v19 = vld [vmem:[%s1420_s14] sm:$0xff]  ;;  %v498_v20 = vsub.s32 %v495_v17, %v497_v18  ;;  %s1144_s24 = smov [#allocation10]  }
  0x9d   : > { %836 = vmatprep.subr.bf16.mxu1 %v831_v7  ;;  %v492_v21 = vcombine.high %v482_v19, %v482_v19  ;;  %p1047_p13 = pnand %p1046_p5, %p1561_p10  ;;  %s1049_s21 = sshll.u32 %s1144_s24, 4  ;;  %s1050_s21 = int_to_ptr.vmem [resolvable:$false] %s1049_s21 }
  0x9e   : > { %v499_v22 = vrot.slane %v482_v19, %v498_v20  ;;  %s1051_s23 = scalar_lea.vmem %s1050_s21, 2048  ;;  %p1052_p3 = scmp.lt.s32.totalorder %s1465_s17, %s1050_s21 }
  0x9f   : > { %834 = vmatpush3.bf16.msra.mxu0 %v831_v7  ;;  %v506_v23 = vrot.slane %v492_v21, %v498_v20  ;;  %p1048_p7 = pneg %p1047_p13  ;;  %p1053_p6 = scmp.lt.s32.totalorder %s1051_s23, %s1045_s1 }
  0xa0   : > { %838 = vmatpush3.bf16.msra.mxu1 %v831_v7  ;;  %v507_v24 = vcombine.high %v499_v22, %v499_v22  ;;  %v515_v29 = vrot.slane %v499_v22, %v498_v20 }
  0xa1   : > { %v508_v25 = vcombine.high %v506_v23, %v506_v23  ;;  %v522_v30 = vrot.slane %v506_v23, %v498_v20  ;;  %p1054_p8 = por %p1053_p6, %p1052_p3 }
  0xa2   : > { %816 = vmatmul.mubr.msk.f32.vlgmr.msra.gmra.mrb[0].mxu0 %vm349_vm0, %v338_v8  ;;  %v529_v26 = vrot.slane %v507_v24, %v498_v20  ;;  %v544_v38 = vrot.slane %v515_v29, %v543_v27  ;;  %v537_v40 = vcombine.high %v515_v29, %v515_v29 }
  0xa3   : > { %822 = vmatmul.mubr.msk.f32.vlgmr.msra.gmra.mrb[0].mxu1 %vm349_vm0, %v342_v9  ;;  %818 = vmatprep.mubr.msk.f32.mxu0 %vm349_vm0, %v339_v10  ;;  %v536_v28 = vrot.slane %v508_v25, %v498_v20  ;;  %v560_v39 = vrot.slane %v522_v30, %v543_v27  ;;  %v538_v41 = vcombine.high %v522_v30, %v522_v30  ;;  %p1055_p12 = pnand %p1054_p8, %p1048_p7 }
  0xa4   : > { %824 = vmatprep.mubr.msk.f32.mxu1 %vm349_vm0, %v343_v11  ;;  %v548_v32 = vrot.slane %v529_v26, %v543_v27  ;;  %v539_v34 = vcombine.high %v529_v26, %v529_v26  ;;  %v552_v56 = vrot.slane %v537_v40, %v543_v27 }
  0xa5   : > { %v564_v33 = vrot.slane %v536_v28, %v543_v27  ;;  %v540_v35 = vcombine.high %v536_v28, %v536_v28  ;;  %v568_v57 = vrot.slane %v538_v41, %v543_v27 }
  0xa6   : > { %819 = vmatmul.mubr.msk.f32.gmra.mrb[2].mxu0 %vm349_vm0, %v340_v12  ;;  %v556_v50 = vrot.slane %v539_v34, %v543_v27 }
  0xa7   : > { %825 = vmatmul.mubr.msk.f32.gmra.mrb[2].mxu1 %vm349_vm0, %v344_v13  ;;  %v572_v51 = vrot.slane %v540_v35, %v543_v27 }
 0x175   : > { %v817_v36 = vpop.f32.mrb[0].mxu0 }
 0x176   : > { %v823_v37 = vpop.f32.mrb[0].mxu1  ;;  %v484_v42 = vadd.f32 %v817_v36, %v479_v31  ;;  %v440_v44 = vpop.f32.mrb[1].mxu0 }
 0x177   : > { %v488_v43 = vadd.f32 %v823_v37, %v479_v31  ;;  %v460_v45 = vpop.f32.mrb[1].mxu1  ;;  %v483_v46 = vadd.f32 %v479_v31, %v440_v44 }
 0x178   : > { %v487_v47 = vadd.f32 %v479_v31, %v460_v45  ;;  %v582_v48 = vadd.f32 %v548_v32, %v484_v42 }
 0x179   : > { %v586_v49 = vadd.f32 %v564_v33, %v488_v43  ;;  %v581_v52 = vadd.f32 %v544_v38, %v483_v46  ;;  %v820_v54 = vpop.f32.mrb[2].mxu0 }
 0x17a   : > { %v585_v53 = vadd.f32 %v560_v39, %v487_v47  ;;  %v826_v55 = vpop.f32.mrb[2].mxu1  ;;  %590 = vst.msk [vmem:[%s334_s6 + $0x8] sm:$0xff] %vm349_vm0, %v582_v48  ;;  %v486_v58 = vadd.f32 %v820_v54, %v479_v31  ;;  %v450_v60 = vpop.f32.mrb[3].mxu0 }
 0x17b   : > { %594 = vst.msk [vmem:[%s334_s6 + $0x28] sm:$0xff] %vm349_vm0, %v586_v49  ;;  %v490_v59 = vadd.f32 %v826_v55, %v479_v31  ;;  %v470_v61 = vpop.f32.mrb[3].mxu1  ;;  %589 = vst.msk [vmem:[%s334_s6] sm:$0xff] %vm349_vm0, %v581_v52  ;;  %v485_v62 = vadd.f32 %v479_v31, %v450_v60 }
 0x17c   : > { %593 = vst.msk [vmem:[%s334_s6 + $0x20] sm:$0xff] %vm349_vm0, %v585_v53  ;;  %v489_v63 = vadd.f32 %v479_v31, %v470_v61  ;;  %v584_v0 = vadd.f32 %v556_v50, %v486_v58 }
 0x17d   : > { %v588_v1 = vadd.f32 %v572_v51, %v490_v59  ;;  %v583_v2 = vadd.f32 %v552_v56, %v485_v62 }
 0x17e   : > { %v587_v3 = vadd.f32 %v568_v57, %v489_v63  ;;  %592 = vst.msk [vmem:[%s334_s6 + $0x18] sm:$0xff] %vm349_vm0, %v584_v0 }
 0x17f   : > { %596 = vst.msk [vmem:[%s334_s6 + $0x38] sm:$0xff] %vm349_vm0, %v588_v1  ;;  %591 = vst.msk [vmem:[%s334_s6 + $0x10] sm:$0xff] %vm349_vm0, %v583_v2 }
 0x180   : > { %595 = vst.msk [vmem:[%s334_s6 + $0x30] sm:$0xff] %vm349_vm0, %v587_v3 }
 0x181   : > { %1058 = shalt.err (!%p1055_p12)
}
 0x182   : > { %s1059_s28 = scalar_lea.hbm %s1463_s26, 1024  ;;  %s1063_s29 = scalar_lea.hbm %s1522_s4, 2048 }
 0x183   : > { %p1060_p0 = scmp.ne.s32.totalorder %s1463_s26, %s1059_s28  ;;  %p1064_p1 = scmp.lt.u32.totalorder %s1463_s26, %s1522_s4 }
 0x184   : > { %p1065_p4 = scmp.lt.u32.totalorder %s1063_s29, %s1059_s28  ;;  %p1067_p5 = scmp.lt.u32.totalorder %s1059_s28, %s1463_s26 }
 0x185   : > { %p1061_p2 = pnand %p1060_p0, %p1561_p10 }
 0x186   : > { %p1066_p11 = por %p1065_p4, %p1064_p1 }
 0x187   : > { %p1062_p9 = pneg %p1061_p2 }
 0x188   : > { %p1068_p13 = por %p1067_p5, %p1066_p11 }
 0x18a   : > { %p1069_p7 = pnand %p1068_p13, %p1062_p9 }
 0x18c   : > { %1072 = shalt.err (!%p1069_p7)
}
 0x18d   : > { %s1145_s9 = smov 128   ;;  %s1146_s27 = smov 8  }
 0x18e   : > { %849 = dma.vmem_to_hbm [thread:$0]  (%p1561_p10), %s1465_s17, 1024, %s1463_s26, %s598_s13, %s1145_s9, %s1145_s9, %s1146_s27  }
 0x18f PF: > { %s1562_s10 = sld [smem:[#allocation15_spill]]  ;;  %s1563_s14 = sld [smem:[#allocation20_spill]] }
 0x190   : > { %s1564_s30 = sld [smem:[#allocation17_spill]] }
 0x195   : > { %s629_s15 = sand.u32 1, %s1562_s10   ;;  %p1565_p3 = scmp.ne.s32.totalorder %s1563_s14, 0 }
 0x196   : > { %p1566_p6 = scmp.ge.s32.totalorder %s1564_s30, 2  ;;  %s630_s22 = scalar_lea.sflag [#allocation4], %s629_s15 }
 0x198   : > { %p866_p8 = pnand %p1566_p6, %p1565_p3 }
 0x19a   : > { %1110 = dma.done.wait (!%p866_p8), %s630_s22, 1024  }
 0x19b   : > { %1112 = vsyncadd (!%p866_p8), %s630_s22, 4294966272  ;;  %s24_s20 = sadd.s32 1, %s1564_s30   ;;  %s1567_s6 = sld [smem:[#allocation16_spill]] }
 0x19c   : > { %p21_p12 = scmp.ge.s32.totalorder %s24_s20, 4   ;;  %s1568_s17 = sld [smem:[#allocation19_spill]] }
 0x19d   : > { %s1569_s8 = sld [smem:[#allocation18_spill]]  ;;  %s1570_s15 = smov %s1119_s16 }
 0x19e   : > { %s1572_s18 = smov %s1131_s19  ;;  %23 = sbr.rel (!%p21_p12) target bundleno = 11 (0xb), region = 110 }
 0x1a1   : > { %s1571_s16 = smov %s1567_s6 }
 0x1a3   : > { %s1573_s19 = smov %s1569_s8 }
 0x1a5   :  { %635 = vsyncpa [#allocation3], 1 }
 0x1a6   :  { %637 = vsyncpa [#allocation3 + $0x1], 1 }
 0x1a7   :  { %638 = vsyncpa [#allocation6], 1 }
 0x1a8   :  { %640 = vsyncpa [#allocation6 + $0x1], 1 }
 0x1a9   :  { %641 = vsyncpa [#allocation9], 1 }
 0x1aa   :  { %642 = vsyncpa [#allocation4], 1 }
 0x1ab   :  { %644 = vsyncpa [#allocation4 + $0x1], 1 }

</bundles_post_ra>
